<compile_context>
chip_gen: v5e
topology: v5e:2x2
jax: 0.10.0
libtpu: 0.0.40
codegen_flags: <defaults>
</compile_context>

<pallas_src>
import jax
import jax.numpy as jnp
from jax.experimental import pallas as pl
from jax.experimental.pallas import tpu as pltpu

_MIB = 1024 * 1024


def _cdiv(a, b):
    return -(-a // b)


def _round_up(a, b):
    return _cdiv(a, b) * b


# --------------------------------------------------------------------------- #
# Kernels
# --------------------------------------------------------------------------- #
def _matmul_kernel(x_ref, m_ref, o_ref):
    # x_ref: (Bt, K)  m_ref: (K, tn)  o_ref: (Bt, tn) f32
    o_ref[...] = jnp.dot(x_ref[...], m_ref[...],
                         preferred_element_type=jnp.float32)


def _matmul_kernel_ktiled(x_ref, m_ref, o_ref):
    # Grid axis 2 is the contraction axis ("arbitrary", innermost); the f32
    # output block stays resident in VMEM across it, so accumulate in place.
    @pl.when(pl.program_id(2) == 0)
    def _init():
        o_ref[...] = jnp.zeros_like(o_ref)

    o_ref[...] += jnp.dot(x_ref[...], m_ref[...],
                          preferred_element_type=jnp.float32)


# --------------------------------------------------------------------------- #
# One-time operator fold (wrapper side, f32 HIGHEST precision)
# --------------------------------------------------------------------------- #
def _build_folded_operator(wpos_r, wpos_i, wneg_r, wneg_i,
                           cin, cout, m0, m1, L, Hp, Lp):
    """Pre-contract rDFT, spectral weights, row iDFT and column irDFT into one
    real matrix M of shape (cin*L, cout*Hp*Lp)."""
    hp = jax.lax.Precision.HIGHEST
    Wf = Lp // 2 + 1

    # Forward rDFT of the (zero-padded to Lp) length-L signal, first m1 freqs.
    s = jnp.arange(L, dtype=jnp.float32)[:, None]
    w = jnp.arange(m1, dtype=jnp.float32)[None, :]
    ang_f = 2.0 * jnp.pi * s * w / Lp
    Fr, Fi = jnp.cos(ang_f), -jnp.sin(ang_f)                      # (L, m1)

    # Spectral weights: dense along h (so the torch "neg overwrites pos on
    # overlap" semantics is exact), mode-compact along w (only m1 columns).
    Wr = jnp.zeros((cin, cout, Hp, m1), jnp.float32)
    Wi = jnp.zeros((cin, cout, Hp, m1), jnp.float32)
    Wr = Wr.at[:, :, :m0, :].set(wpos_r)
    Wi = Wi.at[:, :, :m0, :].set(wpos_i)
    Wr = Wr.at[:, :, Hp - m0:, :].set(wneg_r)
    Wi = Wi.at[:, :, Hp - m0:, :].set(wneg_i)

    # Inverse complex DFT over the time-frequency axis (scaled 1/Hp).
    t = jnp.arange(Hp, dtype=jnp.float32)[:, None]
    h = jnp.arange(Hp, dtype=jnp.float32)[None, :]
    ang_g = 2.0 * jnp.pi * t * h / Hp
    Gr, Gi = jnp.cos(ang_g) / Hp, jnp.sin(ang_g) / Hp             # (Hp, Hp)

    # Inverse real DFT over the spatial-frequency axis (only m1 retained freqs).
    k = jnp.arange(m1, dtype=jnp.float32)[:, None]
    l = jnp.arange(Lp, dtype=jnp.float32)[None, :]
    ang_c = 2.0 * jnp.pi * k * l / Lp
    alpha = jnp.full((m1, 1), 2.0, jnp.float32).at[0, 0].set(1.0)
    if Lp % 2 == 0 and m1 == Wf:
        alpha = alpha.at[m1 - 1, 0].set(1.0)                      # Nyquist bin
    Cr = alpha * jnp.cos(ang_c) / Lp                              # (m1, Lp)
    Ci = -alpha * jnp.sin(ang_c) / Lp

    # Fold the row-iDFT into the weights: A[i,o,t,w] = sum_h G[t,h] * W[i,o,h,w]
    Ar = (jnp.einsum('th,iohw->iotw', Gr, Wr, precision=hp)
          - jnp.einsum('th,iohw->iotw', Gi, Wi, precision=hp))
    Ai = (jnp.einsum('th,iohw->iotw', Gr, Wi, precision=hp)
          + jnp.einsum('th,iohw->iotw', Gi, Wr, precision=hp))

    # Fold the forward rDFT (elementwise in w) and the column irDFT.
    Fr_b, Fi_b = Fr[None, :, None, None, :], Fi[None, :, None, None, :]
    Ar_b, Ai_b = Ar[:, None, :, :, :], Ai[:, None, :, :, :]
    Pr = Fr_b * Ar_b - Fi_b * Ai_b                                # (cin,L,cout,Hp,m1)
    Pi = Fr_b * Ai_b + Fi_b * Ar_b
    M5 = (jnp.einsum('isotw,wl->isotl', Pr, Cr, precision=hp)
          + jnp.einsum('isotw,wl->isotl', Pi, Ci, precision=hp))  # (cin,L,cout,Hp,Lp)
    return M5.reshape(cin * L, cout * Hp * Lp)


def build_spectral_operator_1p1d(wpos_r, wpos_i, wneg_r, wneg_i, out_channels,
                                 modes, T, L, pad=0,
                                 operator_dtype=jnp.bfloat16):
    """Build the folded (cin*L, cout*Hp*Lp) operator ONCE per weight update.

    operator_dtype: bfloat16 (default) halves the dominant HBM stream; the MXU
    still accumulates in f32. Pass jnp.float32 for full operator precision."""
    cin, cout = wpos_r.shape[0], wpos_r.shape[1]
    assert cout == out_channels
    m0, m1 = modes
    Hp, Lp = T + pad, L + pad
    Wf = Lp // 2 + 1
    assert m0 <= Hp and m1 <= Wf, "modes must fit the (padded) output spectrum"
    M = _build_folded_operator(
        wpos_r.astype(jnp.float32), wpos_i.astype(jnp.float32),
        wneg_r.astype(jnp.float32), wneg_i.astype(jnp.float32),
        cin, cout, m0, m1, L, Hp, Lp)
    return M.astype(operator_dtype)


# --------------------------------------------------------------------------- #
# Hardware-aware tiling plan
# --------------------------------------------------------------------------- #
def _vmem_capacity_bytes():
    try:
        return int(pltpu.get_tpu_info().vmem_capacity_bytes)
    except Exception:
        return 64 * _MIB  # conservative default (v7x per-TensorCore VMEM)


def _is_v5():
    try:
        return "v5" in jax.devices()[0].device_kind.lower()
    except Exception:
        return False


def _fit_tn(Bt, Kt, N, op_bytes, budget, out_bytes=4):
    """Largest output-tile width such that ALL double-buffered tiles
    (input (Bt,Kt), operator (Kt,tn), output (Bt,tn)) fit in `budget`.
    Returns a multiple of 128 (lane-dense stores), or N if one tile covers the
    whole output width, or None if nothing fits."""
    fixed = 2 * Bt * Kt * op_bytes
    per_tn = 2 * Kt * op_bytes + 2 * Bt * out_bytes
    avail = budget - fixed
    if avail < per_tn * min(N, 128):
        return None
    tn = avail // per_tn
    if tn >= N:
        return N
    return (tn // 128) * 128


def _plan_tiling(B, K, N, op_bytes):
    """Choose (Bt, tn, Kt, grid order) from problem and hardware sizes."""
    vmem_cap = _vmem_capacity_bytes()
    budget = max(16 * _MIB, vmem_cap - 16 * _MIB)   # headroom for Mosaic scratch
    two_cores = vmem_cap <= 64 * _MIB               # v7x-like: 2 TCs, 64 MiB each
    bt_cap = 128 if _is_v5() else 256               # fill the 256-deep MXU on v6e/v7x

    # 1) Preferred: nb == 1 so the folded operator is streamed from HBM once.
    Bt = _round_up(B, 8)
    tn = _fit_tn(Bt, K, N, op_bytes, budget)
    if tn is not None:
        if two_cores and _cdiv(N, tn) == 1 and N >= 256:
            tn = _round_up(_cdiv(N, 2), 128)        # give both v7x cores a block
        return dict(Bt=Bt, tn=tn, Kt=K, order="n_fast", vmem_cap=vmem_cap)

    # 2) Batch too large to keep resident: block it; pick the grid-axis order
    #    that minimizes re-streamed HBM bytes.
    bt_top = min(bt_cap, _round_up(B, 8))
    for Bt in [c for c in (bt_top, 128, 64, 32, 16, 8) if c <= bt_top]:
        tn = _fit_tn(Bt, K, N, op_bytes, budget)
        if tn is not None:
            nb, nn = _cdiv(B, Bt), _cdiv(N, tn)
            n_fast_extra = (nb - 1) * K * N * op_bytes   # M re-streamed nb times
            b_fast_extra = (nn - 1) * B * K * op_bytes   # x0 re-streamed nn times
            order = "n_fast" if n_fast_extra <= b_fast_extra else "b_fast"
            return dict(Bt=Bt, tn=tn, Kt=K, order=order, vmem_cap=vmem_cap)

    # 3) Very large cin*L: tile the contraction axis too (accumulate in the
    #    resident f32 output block). Kt must be a multiple of 128 (lane dim of
    #    the x0 block).
    Bt = min(bt_cap, _round_up(B, 8))
    tn = min(_round_up(N, 128), 512)
    fixed = 2 * Bt * tn * 4
    per_k = 2 * (Bt + tn) * op_bytes
    Kt = max(128, ((budget - fixed) // per_k) // 128 * 128)
    Kt = min(Kt, _round_up(K, 128))
    return dict(Bt=Bt, tn=tn, Kt=Kt, order="n_fast", vmem_cap=vmem_cap)


# --------------------------------------------------------------------------- #
# Forward application
# --------------------------------------------------------------------------- #
def apply_spectral_operator_1p1d(x, operator, out_channels, pad=0, plan=None):
    """Apply a pre-built folded operator (see build_spectral_operator_1p1d)."""
    B, cin, T, L = x.shape
    Hp, Lp = T + pad, L + pad
    K = cin * L
    N = out_channels * Hp * Lp
    assert operator.shape == (K, N), (operator.shape, (K, N))

    op_dtype = operator.dtype
    op_bytes = jnp.dtype(op_dtype).itemsize
    if plan is None:
        plan = _plan_tiling(B, K, N, op_bytes)
    Bt, tn, Kt, order = plan["Bt"], plan["tn"], plan["Kt"], plan["order"]
    Kt = min(Kt, K)

    x0 = x[:, :, 0, :].reshape(B, K).astype(op_dtype)
    M = operator

    k_tiled = Kt < K
    K_eff = K
    if k_tiled:
        # A ragged last K block would leak unspecified values into valid
        # outputs, so pad the contraction axis to a multiple of Kt (zeros are
        # harmless under accumulation).
        # TODO(synk): pre-pad K inside build_spectral_operator_1p1d so this
        # copy of the large operator stays off the per-call hot path.
        K_eff = _round_up(K, Kt)
        if K_eff != K:
            x0 = jnp.pad(x0, ((0, 0), (0, K_eff - K)))
            M = jnp.pad(M, ((0, K_eff - K), (0, 0)))

    nb, nn, nk = _cdiv(B, Bt), _cdiv(N, tn), _cdiv(K_eff, Kt)

    tile_bytes = 2 * (Bt * Kt * op_bytes + Kt * tn * op_bytes + Bt * tn * 4)
    vmem_cap = plan.get("vmem_cap", _vmem_capacity_bytes())
    vmem_limit = int(min(vmem_cap, max(32 * _MIB, tile_bytes + 8 * _MIB)))

    if k_tiled:
        grid = (nb, nn, nk)
        in_specs = [pl.BlockSpec((Bt, Kt), lambda b, n, k: (b, k)),
                    pl.BlockSpec((Kt, tn), lambda b, n, k: (k, n))]
        out_spec = pl.BlockSpec((Bt, tn), lambda b, n, k: (b, n))
        kernel = _matmul_kernel_ktiled
        semantics = ("parallel", "parallel", "arbitrary")
    elif order == "b_fast":
        grid = (nn, nb)          # M block constant across the fast batch axis
        in_specs = [pl.BlockSpec((Bt, Kt), lambda n, b: (b, 0)),
                    pl.BlockSpec((Kt, tn), lambda n, b: (0, n))]
        out_spec = pl.BlockSpec((Bt, tn), lambda n, b: (b, n))
        kernel = _matmul_kernel
        semantics = ("parallel", "parallel")
    else:
        grid = (nb, nn)          # x0 block constant across the fast N axis
        in_specs = [pl.BlockSpec((Bt, Kt), lambda b, n: (b, 0)),
                    pl.BlockSpec((Kt, tn), lambda b, n: (0, n))]
        out_spec = pl.BlockSpec((Bt, tn), lambda b, n: (b, n))
        kernel = _matmul_kernel
        semantics = ("parallel", "parallel")

    out2d = pl.pallas_call(
        kernel,
        out_shape=jax.ShapeDtypeStruct((B, N), jnp.float32),
        grid=grid,
        in_specs=in_specs,
        out_specs=out_spec,
        compiler_params=pltpu.CompilerParams(
            dimension_semantics=semantics,
            vmem_limit_bytes=vmem_limit,
        ),
    )(x0, M)

    y = out2d.reshape(B, out_channels, Hp, Lp)
    if pad > 0:
        y = y[:, :, :-pad, :-pad]
    return y


def spectral_operator_1p1d(x, wpos_r, wpos_i, wneg_r, wneg_i, modes,
                           out_channels, pad=0, operator_dtype=jnp.bfloat16,
                           plan=None):
    """One-shot convenience wrapper. For repeated forwards with fixed weights,
    call build_spectral_operator_1p1d once and apply_spectral_operator_1p1d
    per call (keeps the HIGHEST-precision fold off the hot path)."""
    _, _, T, L = x.shape
    M = build_spectral_operator_1p1d(wpos_r, wpos_i, wneg_r, wneg_i,
                                     out_channels, modes, T, L, pad=pad,
                                     operator_dtype=operator_dtype)
    return apply_spectral_operator_1p1d(x, M, out_channels, pad=pad, plan=plan)


# --------------------------------------------------------------------------- #
# Validation reference + self-test
# --------------------------------------------------------------------------- #
def reference_forward(x, wpos_c, wneg_c, modes, out_channels, pad=0):
    """Pure-JAX re-implementation of the torch forward (validation only)."""
    m0, m1 = modes
    N0, N1 = x.shape[-2], x.shape[-1]
    x0 = x[:, :, 0:1, :]
    b, c, t, l = x0.shape
    xq = jnp.fft.rfft2(x0, s=(t, l + pad))
    H = N0 + pad
    Wf = (N1 + pad) // 2 + 1
    xout = jnp.zeros((b, out_channels, H, Wf), dtype=jnp.complex64)
    prod_pos = jnp.einsum('biw,iohw->bohw', xq[:, :, 0, :m1], wpos_c)
    prod_neg = jnp.einsum('biw,iohw->bohw', xq[:, :, 0, :m1], wneg_c)
    xout = xout.at[:, :, :m0, :m1].set(prod_pos)
    xout = xout.at[:, :, H - m0:, :m1].set(prod_neg)
    y = jnp.fft.irfft2(xout, s=(N0 + pad, N1 + pad))
    if pad > 0:
        y = y[:, :, :-pad, :-pad]
    return y


if __name__ == "__main__":
    def _run_case(B, Cin, Cout, T, L, modes, pad, plan=None, seed=0):
        key = jax.random.PRNGKey(seed)
        k1, k2, k3, k4, k5 = jax.random.split(key, 5)
        x = jax.random.normal(k1, (B, Cin, T, L), dtype=jnp.float32)

        # deterministic xavier-uniform-like init for the complex spectral weights
        fan_in = Cout * modes[0] * modes[1]
        fan_out = Cin * modes[0] * modes[1]
        bound = (6.0 / (fan_in + fan_out)) ** 0.5
        wshape = (Cin, Cout, modes[0], modes[1])
        wpos_r = jax.random.uniform(k2, wshape, jnp.float32, -bound, bound)
        wpos_i = jax.random.uniform(k3, wshape, jnp.float32, -bound, bound)
        wneg_r = jax.random.uniform(k4, wshape, jnp.float32, -bound, bound)
        wneg_i = jax.random.uniform(k5, wshape, jnp.float32, -bound, bound)

        # build once (per weight update / pad), apply per forward
        M = build_spectral_operator_1p1d(wpos_r, wpos_i, wneg_r, wneg_i,
                                         Cout, modes, T, L, pad=pad)
        out = apply_spectral_operator_1p1d(x, M, Cout, pad=pad, plan=plan)
        out = jax.block_until_ready(out)

        ref = reference_forward(x, wpos_r + 1j * wpos_i, wneg_r + 1j * wneg_i,
                                modes, Cout, pad=pad)
        ref = jax.block_until_ready(ref)
        assert out.shape == ref.shape == (B, Cout, T, L), \
            f"bad shape {out.shape} vs {ref.shape} (pad={pad})"
        err = float(jnp.max(jnp.abs(out - ref)))
        scale = float(jnp.max(jnp.abs(ref))) + 1e-12
        # bf16 operator storage keeps ~3 decimal digits (f32 MXU accumulation)
        assert err / scale < 2e-2, \
            f"pad={pad}: max abs err {err}, scale {scale}"

    # auto-planned, single M stream (nb == 1), lane-dense output tiles
    _run_case(2, 2, 2, 16, 16, (4, 5), pad=0)
    _run_case(2, 2, 2, 16, 16, (4, 5), pad=3)
    # forced plan: exercises the K-tiled accumulator kernel and the
    # overhanging (masked) batch tile path
    _run_case(2, 2, 2, 8, 128, (3, 7), pad=0,
              plan=dict(Bt=8, tn=256, Kt=128, order="n_fast"))
    print("KERNEL_OK")
</pallas_src>

<mosaic_0001>
module attributes {stable_mosaic.version = 11 : i64} {
  func.func @_matmul_kernel(%arg0: i32, %arg1: i32, %arg2: memref<8x32xbf16, #tpu.memory_space<vmem>>, %arg3: memref<32x256xbf16, #tpu.memory_space<vmem>>, %arg4: memref<8x256xf32, #tpu.memory_space<vmem>>) attributes {dimension_semantics = [#tpu.dimension_semantics<parallel>, #tpu.dimension_semantics<parallel>], iteration_bounds = array<i64: 1, 2>, scalar_prefetch = 0 : i64, scratch_operands = 0 : i64, tpu.core_type = #tpu.core_type<tc>, window_params = [{transform_indices = @transform_0, window_bounds = array<i64: 8, 32>}, {transform_indices = @transform_1, window_bounds = array<i64: 32, 256>}, {transform_indices = @transform_2, window_bounds = array<i64: 8, 256>}]} {
    %c0 = arith.constant 0 : index
    %c0_0 = arith.constant 0 : index
    %0 = vector.load %arg2[%c0, %c0_0] : memref<8x32xbf16, #tpu.memory_space<vmem>>, vector<8x32xbf16>
    %c0_1 = arith.constant 0 : index
    %c0_2 = arith.constant 0 : index
    %1 = vector.load %arg3[%c0_1, %c0_2] : memref<32x256xbf16, #tpu.memory_space<vmem>>, vector<32x256xbf16>
    %cst = arith.constant dense<0.000000e+00> : vector<8x256xf32>
    %2 = tpu.matmul %0, %1, %cst {dimension_numbers = #tpu.dot_dimension_numbers<[1], [0], [0], [1], [0, 0, 1, 1], [], []>} : vector<8x32xbf16>, vector<32x256xbf16>, vector<8x256xf32> -> vector<8x256xf32>
    %c0_3 = arith.constant 0 : index
    %c0_4 = arith.constant 0 : index
    %3 = vector.load %arg4[%c0_3, %c0_4] : memref<8x256xf32, #tpu.memory_space<vmem>>, vector<8x256xf32>
    tpu.vector_store %arg4[%c0_3, %c0_4], %2 {strides = array<i32>} : memref<8x256xf32, #tpu.memory_space<vmem>>, vector<8x256xf32>,
    return
  }
  func.func @transform_0(%arg0: i32, %arg1: i32) -> (i32, i32) {
    %c0_i32 = arith.constant 0 : i32
    %c0_i32_0 = arith.constant 0 : i32
    return %arg0, %c0_i32 : i32, i32
  }
  func.func @transform_1(%arg0: i32, %arg1: i32) -> (i32, i32) {
    %c0_i32 = arith.constant 0 : i32
    %c0_i32_0 = arith.constant 0 : i32
    return %c0_i32, %arg1 : i32, i32
  }
  func.func @transform_2(%arg0: i32, %arg1: i32) -> (i32, i32) {
    %c0_i32 = arith.constant 0 : i32
    return %arg0, %arg1 : i32, i32
  }
}

</mosaic_0001>

<bundles_post_ra>
// kernel: tpu_custom_call.1
= control target key start
LH: loop header
LB: loop body
LE: loop exit
PB: predicated region body
PF: predicated region fallthrough
CT: control target
= control target key end

     0   :  { %7 = vsyncpa [#allocation3], 0  ;;  %s845_s0 = inlined_call_operand.hbm [shape: bf16[2,32], index: 0, kind: input, shape index: {}]   ;;  %s846_s1 = inlined_call_operand.hbm [shape: bf16[32,512], index: 1, kind: input, shape index: {}]   ;;  %s847_s2 = inlined_call_operand.hbm [shape: f32[2,512], index: 2, kind: output, shape index: {}]  }
   0x1   :  { %8 = vsyncpa [#allocation6], 0 }
   0x2   :  { %10 = vsyncpa [#allocation6 + $0x1], 0 }
   0x3   :  { %11 = vsyncpa [#allocation4], 0 }
   0x4   :  { %13 = vsyncpa [#allocation4 + $0x1], 0  ;;  %s704_s9 = smov 0   ;;  %s706_s10 = smov 0  }
   0x5   :  { %s708_s11 = smov 0   ;;  %s710_s12 = smov 0  }
   0x6   :  { %s712_s13 = smov 0   ;;  %s714_s14 = smov 0  }
   0x7 LB: > { %s735_s15 = sadd.s32 4294967295, %s678_s14   ;;  %s429_s16 = sadd.s32 4294967294, %s678_s14   ;;  %s678_s14 = sphi %s714_s14, %s19_s14   ;;  %s674_s13 = sphi %s712_s13, %s857_s13   ;;  %s670_s12 = sphi %s710_s12, %s856_s12   ;;  %s666_s11 = sphi %s708_s11, %s855_s11   ;;  %s662_s10 = sphi %s706_s10, %s854_s10   ;;  %s658_s9 = sphi %s704_s9, %s853_s9  }
   0x8   : > { %s28_s17 = sadd.s32 1, %s674_s13  ;;  %s64_s18 = sadd.s32 1, %s666_s11 }
   0x9   : > { %p29_p0 = scmp.ge.s32.totalorder %s28_s17, 2  ;;  %p71_p1 = scmp.ne.s32.totalorder %s666_s11, %s662_s10 }
   0xa   : > { %p72_p2 = scmp.eq.s32.totalorder %s678_s14, 0  ;;  %p77_p3 = scmp.ne.s32.totalorder %s662_s10, %s658_s9 }
   0xb   : > { %s859_s17 = smov (%p29_p0, %s28_s17), 0  ;;  %p78_p5 = scmp.eq.s32.totalorder %s735_s15, 0 }
   0xc   : > { %p747_p4 = por %p72_p2, %p71_p1  ;;  %s61_s20 = ssub.s32 %s674_s13, %s859_s17 }
   0xd   : > { %p103_p6 = scmp.eq.s32.totalorder %s735_s15, 1  ;;  %p62_p7 = scmp.eq.s32.totalorder %s61_s20, 0 }
   0xe   : > { %p757_p8 = por %p78_p5, %p77_p3  ;;  %p109_p10 = scmp.eq.s32.totalorder %s429_s16, 1 }
   0xf   : > { %p761_p9 = por %p103_p6, %p71_p1  ;;  %p430_p12 = scmp.ge.s32.totalorder %s678_s14, 1 }
  0x10   : > { %s766_s23 = scalar_select %p62_p7, %s666_s11, %s64_s18  }
  0x11   : > { %p768_p11 = por %p109_p10, %p77_p3  ;;  %p116_p13 = scmp.lt.s32.totalorder %s678_s14, 3 }
  0x13   : > { %p774_p0 = pnand %p430_p12, %p116_p13 }
  0x14   : > { %p431_p1 = scmp.ne.s32.totalorder (!%p774_p0), %s735_s15, 0 }
  0x15   : > { %120 = sbr.rel (%p774_p0) target bundleno = 35 (0x23), region = 12 }
  0x1a   : > { %124 = sbr.rel (%p431_p1) target bundleno = 35 (0x23), region = 16 }
  0x1f   : > { %129 = vsyncadd [#allocation3], 48  ;;  %s132_s28 = sshll.u32 %s845_s0, 4  ;;  %s680_s29 = smov [#allocation2]   ;;  %s133_s28 = int_to_ptr.hbm [resolvable:$true] %s132_s28 }
  0x20   : > { %s134_s30 = sshll.u32 %s680_s29, 4  ;;  %s681_s3 = smov 16   ;;  %s135_s30 = int_to_ptr.vmem [resolvable:$true] %s134_s30 }
  0x21   : > { %s682_s4 = smov 1  }
  0x22   : > { %140 = dma.hbm_to_vmem [thread:$0]  %s133_s28, 16, %s135_s30, [#allocation3], %s681_s3, %s681_s3, %s682_s4  }
  0x23 PF: > { %p432_p2 = scmp.ge.s32.totalorder %s678_s14, 2  ;;  %p482_p3 = scmp.lt.s32.totalorder %s678_s14, 2 }
  0x24   : > { %s148_s5 = sand.u32 1, %s666_s11   ;;  %s463_s6 = sshll.u32 %s674_s13, 3 }
  0x25   : > { %s433_s7 = sshll.u32 %s148_s5, 5  ;;  %s157_s18 = scalar_lea.hbm %s846_s1, %s463_s6 }
  0x26   : > { %s158_s20 = sshll.u32 %s157_s18, 4  ;;  %s152_s26 = scalar_lea.vmem [#allocation5], %s433_s7  ;;  %s159_s20 = int_to_ptr.hbm [resolvable:$true] %s158_s20 }
  0x27   : > { %s160_s27 = sshll.u32 %s152_s26, 4  ;;  %p475_p6 = pnand %p482_p3, %p747_p4  ;;  %s161_s27 = int_to_ptr.vmem [resolvable:$true] %s160_s27 }
  0x28   : > { %s149_s28 = scalar_lea.sflag [#allocation6], %s148_s5  ;;  %s683_s29 = smov 256  }
  0x29   : > { %s684_s30 = smov 128   ;;  %s685_s3 = smov 8  }
  0x2a   : > { %477 = dma.hbm_to_vmem [thread:$0]  (!%p475_p6), %s159_s20, 512, %s161_s27, %s149_s28, %s683_s29, %s684_s30, %s685_s3  }
  0x2b   : > { %172 = sbr.rel (%p774_p0) target bundleno = 217 (0xd9), region = 28 }
  0x30   : > { %645 = dma.done.wait (%p78_p5), [#allocation3], 64  }
  0x31   : > { %647 = vsyncadd (%p78_p5), [#allocation3], 4294967232  ;;  %s800_s4 = sand.u32 1, %s662_s10  }
  0x32   : > { %s438_s19 = sshll.u32 %s800_s4, 5  ;;  %s180_s5 = scalar_lea.sflag [#allocation6], %s800_s4 }
  0x33   : > { %s183_s6 = scalar_lea.vmem [#allocation5], %s438_s19 }
  0x34   : > { %649 = dma.done.wait (%p757_p8), %s180_s5, 512  }
  0x35   : > { %651 = vsyncadd (%p757_p8), %s180_s5, 4294966784  ;;  %v450_v0 = vld [vmem:[%s183_s6 + $0x10] sm:$0xf]  ;;  %v467_v1 = vld [vmem:[%s183_s6 + $0x14] sm:$0xf0]  ;;  %vm254_vm0 = vcmask 261120  }
  0x36   : > { %v466_v2 = vld [vmem:[%s183_s6 + $0x14] sm:$0xf]  ;;  %v451_v3 = vor.u32 %v467_v1, %v450_v0  ;;  %v452_v4 = vld [vmem:[%s183_s6 + $0x18] sm:$0xf0]  ;;  %v442_v5 = vld [vmem:[%s183_s6] sm:$0xf] }
  0x37   : > { %v465_v6 = vld [vmem:[%s183_s6 + $0x4] sm:$0xf0]  ;;  %v455_v7 = vor.u32 %v466_v2, %v452_v4  ;;  %v464_v8 = vld [vmem:[%s183_s6 + $0x4] sm:$0xf]  ;;  %v444_v9 = vld [vmem:[%s183_s6 + $0x8] sm:$0xf0] }
  0x38   : > { %v214_v10 = vld [vmem:[#allocation2] sm:$0x1]  ;;  %263 = vmatpush.bf16.msra.mxu0 %v451_v3  ;;  %v443_v11 = vor.u32 %v465_v6, %v442_v5  ;;  %v215_v12 = vld [vmem:[#allocation2 + $0x1] sm:$0x1]  ;;  %v216_v13 = vld [vmem:[#allocation2 + $0x2] sm:$0x1]  ;;  %v447_v14 = vor.u32 %v464_v8, %v444_v9 }
  0x39   : > { %276 = vmatpush.bf16.msra.mxu1 %v455_v7  ;;  %v217_v15 = vld [vmem:[#allocation2 + $0x3] sm:$0x1]  ;;  %223 = vst [vmem:[#allocation1] ss:$9 sm:$0xff] %v214_v10  ;;  %s439_s15 = sshll.u32 %s800_s4, 4  ;;  %vm286_vm1 = vcmask 1041408  }
  0x3a   : > { %226 = vst [vmem:[#allocation1 + $0x1] ss:$9 sm:$0xff] %v215_v12  ;;  %vm288_vm2 = vcmask 1043458   ;;  %vm291_vm3 = vcmask 1045508   ;;  %vm294_vm4 = vcmask 1045504   ;;  %s204_s21 = scalar_lea.vmem [#allocation7], %s439_s15 }
  0x3b   : > { %229 = vst [vmem:[#allocation1 + $0x2] ss:$9 sm:$0xff] %v216_v13  ;;  %s306_s25 = scalar_lea.sflag [#allocation4], %s800_s4 }
  0x3c   : > { %264 = vmatpush.bf16.msra.mxu0 %v443_v11  ;;  %232 = vst [vmem:[#allocation1 + $0x3] ss:$9 sm:$0xff] %v217_v15 }
  0x3d   : > { %277 = vmatpush.bf16.msra.mxu1 %v447_v14 }
  0x43   : > { %v233_v16 = vld [vmem:[#allocation1] sm:$0xff] }
  0x44   : > { %456 = vmatmul.msk.bf16.vlgmr.msra.gmra.mxu0 %vm254_vm0, %v233_v16  ;;  %457 = vmatmul.msk.bf16.vlgmr.msra.gmra.mxu1 %vm254_vm0, %v233_v16 }
  0xc1   : > { %v266_v17 = vpop.f32.mrf.mxu0  ;;  %v279_v18 = vpop.f32.mrf.mxu1 }
  0xc2   : > { %v285_v19 = vrot.slane %v279_v18, 6 }
  0xc4   : > { %v287_v20 = vsel %vm286_vm1, %v266_v17, %v285_v19  ;;  %v289_v21 = vsel %vm288_vm2, %v266_v17, %v285_v19  ;;  %v292_v22 = vsel %vm291_vm3, %v266_v17, %v285_v19  ;;  %v295_v23 = vsel %vm294_vm4, %v285_v19, %v266_v17 }
  0xc5   : > { %v290_v24 = vrot.slane %v289_v21, 2  ;;  %v293_v25 = vrot.slane %v292_v22, 4  ;;  %v296_v26 = vrot.slane %v295_v23, 6  ;;  %301 = vst [vmem:[%s204_s21] sm:$0xf] %v287_v20  ;;  %312 = sbr.rel (!%p761_p9) target bundleno = 217 (0xd9), region = 40 }
  0xc7   : > { %302 = vst [vmem:[%s204_s21 + $0x4] sm:$0xf] %v290_v24 }
  0xc8   : > { %303 = vst [vmem:[%s204_s21 + $0x8] sm:$0xf] %v293_v25 }
  0xc9   : > { %304 = vst [vmem:[%s204_s21 + $0xc] sm:$0xf] %v296_v26  ;;  %v268_v27 = vpop.f32.mrf.mxu0  ;;  %v281_v28 = vpop.f32.mrf.mxu1 }
  0xca   : > { %320 = vsyncadd %s306_s25, 192  ;;  %s468_s7 = sshll.u32 %s670_s12, 2  ;;  %s327_s8 = sshll.u32 %s204_s21, 4  ;;  %s328_s8 = int_to_ptr.vmem [resolvable:$true] %s327_s8 }
  0xcb   : > { %s325_s20 = scalar_lea.hbm %s847_s2, %s468_s7  ;;  %s612_s22 = scalar_lea.hbm %s847_s2, 8 }
  0xcc   : > { %s329_s26 = sshll.u32 %s325_s20, 4  ;;  %s330_s26 = int_to_ptr.hbm [resolvable:$true] %s329_s26 }
  0xcd   : > { %s608_s27 = sshra.s32 %s330_s26, 4  ;;  %s609_s27 = int_to_ptr.hbm [resolvable:$true] %s608_s27 }
  0xce   : > { %s610_s28 = scalar_lea.hbm %s609_s27, 4  ;;  %p613_p5 = scmp.lt.s32.totalorder %s609_s27, %s847_s2 }
  0xcf   : > { %p611_p4 = scmp.ne.s32.totalorder %s609_s27, %s610_s28  ;;  %p614_p7 = scmp.lt.s32.totalorder %s612_s22, %s610_s28 }
  0xd1   : > { %p615_p8 = por %p614_p7, %p613_p5 }
  0xd3   : > { %p616_p9 = pnand %p615_p8, %p611_p4 }
  0xd5   : > { %619 = shalt.err (!%p616_p9)
}
  0xd6   : > { %s686_s12 = smov 64   ;;  %s687_s19 = smov 128  }
  0xd7   : > { %s688_s5 = smov 4  }
  0xd8   : > { %335 = dma.vmem_to_hbm [thread:$0]  %s328_s8, 64, %s330_s26, %s306_s25, %s686_s12, %s687_s19, %s688_s5  }
  0xd9 PF: > { %s344_s6 = sand.u32 1, %s658_s9   ;;  %p479_p10 = pnand %p432_p2, %p768_p11 }
  0xda   : > { %s345_s15 = scalar_lea.sflag [#allocation4], %s344_s6 }
  0xdb   : > { %p480_p12 = pneg %p479_p10 }
  0xdd   : > { %653 = dma.done.wait (%p480_p12), %s345_s15, 256  }
  0xde   : > { %655 = vsyncadd (%p480_p12), %s345_s15, 4294967040  ;;  %s19_s14 = sadd.s32 1, %s678_s14   ;;  %s853_s9 = smov %s662_s10 }
  0xdf   : > { %p16_p13 = scmp.ge.s32.totalorder %s19_s14, 4   ;;  %s854_s10 = smov %s666_s11 }
  0xe0   : > { %s855_s11 = smov %s766_s23  ;;  %s856_s12 = smov %s674_s13 }
  0xe1   : > { %s857_s13 = smov %s859_s17  ;;  %18 = sbr.rel (!%p16_p13) target bundleno = 7 (0x7), region = 82 }
  0xe6   :  { %351 = vsyncpa [#allocation3], 1 }
  0xe7   :  { %353 = vsyncpa [#allocation3 + $0x1], 1 }
  0xe8   :  { %354 = vsyncpa [#allocation6], 1 }
  0xe9   :  { %356 = vsyncpa [#allocation6 + $0x1], 1 }
  0xea   :  { %357 = vsyncpa [#allocation4], 1 }
  0xeb   :  { %359 = vsyncpa [#allocation4 + $0x1], 1 }

</bundles_post_ra>
